<compile_context>
chip_gen: v7x
topology: tpu7x:2x2x1
jax: 0.10.0
libtpu: 0.0.40
codegen_flags: <defaults>
</compile_context>

<pallas_src>
import functools
import math

import jax
import jax.numpy as jnp
import numpy as np
from jax.experimental import pallas as pl
from jax.experimental.pallas import tpu as pltpu


# ---------------------------------------------------------------------------
# Pallas kernel: one grid step = NB slabs of shape (T, P)
#   h1     = relu(x  @ W1 + b1)            (NB*T, H)
#   h2     = relu(h1 @ W2 + b2)            (NB*T, H2)
#   hidden = A @ h2   (block-diag mean)    (NB,   H2)
#   head   = hidden @ [Wm|Ws] + [bm|bs]    (NB,   2Z)
#   out    = [head[:, :Z], exp(head[:, Z:])]
# ---------------------------------------------------------------------------
def enc_digit_kernel(x_ref, avg_ref, w1_ref, b1_ref, w2_ref, b2_ref,
                     wh_ref, bh_ref, out_ref, *, z_dim):
    x = x_ref[...]                                                  # (NB*T, P) bf16
    h1 = jnp.dot(x, w1_ref[...],
                 preferred_element_type=jnp.float32) + b1_ref[...]  # f32
    h1 = jnp.maximum(h1, 0.0).astype(jnp.bfloat16)
    h2 = jnp.dot(h1, w2_ref[...],
                 preferred_element_type=jnp.float32) + b2_ref[...]  # f32
    h2 = jnp.maximum(h2, 0.0).astype(jnp.bfloat16)
    # Per-slab mean over T rides the MXU via the block-diagonal averaging matrix.
    hidden = jnp.dot(avg_ref[...], h2,
                     preferred_element_type=jnp.float32)            # (NB, H2) f32
    hidden = hidden.astype(jnp.bfloat16)
    head = jnp.dot(hidden, wh_ref[...],
                   preferred_element_type=jnp.float32) + bh_ref[...]  # (NB, 2Z) f32
    lane = jax.lax.broadcasted_iota(jnp.int32, head.shape, 1)
    # First Z lanes: mu.  Last Z lanes: std = exp(log_std).
    out_ref[...] = jnp.where(lane >= z_dim, jnp.exp(head), head)


def enc_digit_pallas(cropped, params, nb=64):
    """Returns (q_mu, q_std), each of shape (S, B, z_what_dim)."""
    S, B, T, P = cropped.shape
    w1, b1, w2, b2, wm, bm, ws, bs = params
    H = w1.shape[1]
    H2 = w2.shape[1]
    Z = wm.shape[1]
    N = S * B

    grid_n = -(-N // nb)           # ceil(N / nb)
    n_pad = grid_n * nb

    # Pad (S*B) slabs up to a multiple of nb with zero slabs, flatten rows.
    x = cropped.reshape(N, T, P).astype(jnp.float32)
    if n_pad > N:
        x = jnp.concatenate(
            [x, jnp.zeros((n_pad - N, T, P), jnp.float32)], axis=0)
    x = x.reshape(n_pad * T, P).astype(jnp.bfloat16)

    # bf16 weights (MXU inputs), f32 biases (added to f32 accumulators).
    w1b = w1.astype(jnp.bfloat16)
    w2b = w2.astype(jnp.bfloat16)
    b1f = b1.astype(jnp.float32)
    b2f = b2.astype(jnp.float32)
    # Fused head: [Wm | Ws] and [bm | bs].
    wh = jnp.concatenate([wm, ws], axis=1).astype(jnp.bfloat16)      # (H2, 2Z)
    bh = jnp.concatenate([bm, bs], axis=1).astype(jnp.float32)       # (1, 2Z)

    # Block-diagonal averaging matrix: avg[i, i*T + t] = 1/T.
    row = jnp.arange(nb)[:, None]
    col = jnp.arange(nb * T)[None, :]
    avg = jnp.where(col // T == row, 1.0 / T, 0.0).astype(jnp.bfloat16)

    full = lambda arr: pl.BlockSpec(arr.shape, lambda n: (0, 0))
    kernel = functools.partial(enc_digit_kernel, z_dim=Z)

    out = pl.pallas_call(
        kernel,
        out_shape=jax.ShapeDtypeStruct((n_pad, 2 * Z), jnp.float32),
        grid=(grid_n,),
        in_specs=[
            pl.BlockSpec((nb * T, P), lambda n: (n, 0)),   # x: NB slabs per step
            full(avg),    # averaging matrix
            full(w1b), full(b1f),
            full(w2b), full(b2f),
            full(wh), full(bh),
        ],
        out_specs=pl.BlockSpec((nb, 2 * Z), lambda n: (n, 0)),
        compiler_params=pltpu.CompilerParams(
            dimension_semantics=("parallel",)),
    )(x, avg, w1b, b1f, w2b, b2f, wh, bh)

    out = out[:N].reshape(S, B, 2 * Z)
    return out[..., :Z], out[..., Z:]


def enc_digit_forward(cropped, params, key, sampled=True, z_what_old=None):
    """Full Enc_digit.forward semantics.

    Returns dict with q_mu, q_std, z_what, log_prob (per-element Normal logpdf),
    mirroring what probtorch's q.normal(...) records.
    """
    q_mu, q_std = enc_digit_pallas(cropped, params)
    if sampled:
        eps = jax.random.normal(key, q_mu.shape, dtype=q_mu.dtype)
        z_what = q_mu + q_std * eps
    else:
        z_what = z_what_old
    # TODO(synk): probtorch Trace bookkeeping has no Pallas/JAX equivalent;
    # we return the Normal log-density that the Trace would record instead.
    log_prob = (-0.5 * ((z_what - q_mu) / q_std) ** 2
                - jnp.log(q_std) - 0.5 * math.log(2.0 * math.pi))
    return {"q_mu": q_mu, "q_std": q_std, "z_what": z_what, "log_prob": log_prob}


# ---------------------------------------------------------------------------
# Deterministic parameter init (matches nn.Linear shapes; uniform +-1/sqrt(fan_in))
# Weights stored as (in_dim, out_dim) == PyTorch weight.T
# ---------------------------------------------------------------------------
def init_params(key, num_pixels, num_hidden, z_what_dim):
    H2 = int(0.5 * num_hidden)

    def linear(k, fan_in, fan_out):
        kw, kb = jax.random.split(k)
        bound = 1.0 / math.sqrt(fan_in)
        w = jax.random.uniform(kw, (fan_in, fan_out), jnp.float32, -bound, bound)
        b = jax.random.uniform(kb, (1, fan_out), jnp.float32, -bound, bound)
        return w, b

    k1, k2, k3, k4 = jax.random.split(key, 4)
    w1, b1 = linear(k1, num_pixels, num_hidden)
    w2, b2 = linear(k2, num_hidden, H2)
    wm, bm = linear(k3, H2, z_what_dim)
    ws, bs = linear(k4, H2, z_what_dim)
    return (w1, b1, w2, b2, wm, bm, ws, bs)


def enc_digit_reference(cropped, params):
    """Pure-JAX reference mirroring the kernel's bf16-input / f32-accumulate math."""
    w1, b1, w2, b2, wm, bm, ws, bs = params
    bf = lambda a: a.astype(jnp.bfloat16).astype(jnp.float32)
    x = bf(cropped)
    h1 = jnp.maximum(x @ bf(w1) + b1[0], 0.0)
    h2 = jnp.maximum(bf(h1) @ bf(w2) + b2[0], 0.0)
    hidden = bf(h2).mean(axis=2)                 # .mean(2) in the PyTorch code
    q_mu = bf(hidden) @ bf(wm) + bm[0]
    q_std = jnp.exp(bf(hidden) @ bf(ws) + bs[0])
    return q_mu, q_std


if __name__ == "__main__":
    # Small, module-consistent shapes.
    S, B, T = 2, 3, 4            # sample dim, batch dim, time/crop dim (mean axis 2)
    num_pixels = 64              # flattened crop pixels
    num_hidden = 32              # -> hidden/2 = 16
    z_what_dim = 10

    root = jax.random.PRNGKey(0)
    k_param, k_data, k_sample = jax.random.split(root, 3)

    params = init_params(k_param, num_pixels, num_hidden, z_what_dim)
    cropped = jax.random.uniform(k_data, (S, B, T, num_pixels), jnp.float32)

    out = enc_digit_forward(cropped, params, k_sample, sampled=True)
    jax.block_until_ready(out)

    # Correctness check against the bf16-mirrored pure-JAX reference.
    ref_mu, ref_std = enc_digit_reference(cropped, params)
    np.testing.assert_allclose(np.asarray(out["q_mu"]), np.asarray(ref_mu),
                               rtol=2e-2, atol=2e-3)
    np.testing.assert_allclose(np.asarray(out["q_std"]), np.asarray(ref_std),
                               rtol=2e-2, atol=2e-3)

    print("KERNEL_OK")
</pallas_src>

<mosaic_0001>
module attributes {stable_mosaic.version = 11 : i64} {
  func.func @enc_digit_kernel(%arg0: i32, %arg1: memref<256x64xbf16, #tpu.memory_space<vmem>>, %arg2: memref<64x256xbf16, #tpu.memory_space<vmem>>, %arg3: memref<64x32xbf16, #tpu.memory_space<vmem>>, %arg4: memref<1x32xf32, #tpu.memory_space<vmem>>, %arg5: memref<32x16xbf16, #tpu.memory_space<vmem>>, %arg6: memref<1x16xf32, #tpu.memory_space<vmem>>, %arg7: memref<16x20xbf16, #tpu.memory_space<vmem>>, %arg8: memref<1x20xf32, #tpu.memory_space<vmem>>, %arg9: memref<64x20xf32, #tpu.memory_space<vmem>>) attributes {dimension_semantics = [#tpu.dimension_semantics<parallel>], iteration_bounds = array<i64: 1>, scalar_prefetch = 0 : i64, scratch_operands = 0 : i64, tpu.core_type = #tpu.core_type<tc>, window_params = [{transform_indices = @transform_0, window_bounds = array<i64: 256, 64>}, {pipeline_mode = #tpu.pipeline_mode<synchronous>, transform_indices = @transform_1, window_bounds = array<i64: 64, 256>}, {pipeline_mode = #tpu.pipeline_mode<synchronous>, transform_indices = @transform_2, window_bounds = array<i64: 64, 32>}, {pipeline_mode = #tpu.pipeline_mode<synchronous>, transform_indices = @transform_3, window_bounds = array<i64: 1, 32>}, {pipeline_mode = #tpu.pipeline_mode<synchronous>, transform_indices = @transform_4, window_bounds = array<i64: 32, 16>}, {pipeline_mode = #tpu.pipeline_mode<synchronous>, transform_indices = @transform_5, window_bounds = array<i64: 1, 16>}, {pipeline_mode = #tpu.pipeline_mode<synchronous>, transform_indices = @transform_6, window_bounds = array<i64: 16, 20>}, {pipeline_mode = #tpu.pipeline_mode<synchronous>, transform_indices = @transform_7, window_bounds = array<i64: 1, 20>}, {transform_indices = @transform_8, window_bounds = array<i64: 64, 20>}]} {
    %c0 = arith.constant 0 : index
    %c0_0 = arith.constant 0 : index
    %0 = vector.load %arg1[%c0, %c0_0] : memref<256x64xbf16, #tpu.memory_space<vmem>>, vector<256x64xbf16>
    %c0_1 = arith.constant 0 : index
    %c0_2 = arith.constant 0 : index
    %1 = vector.load %arg3[%c0_1, %c0_2] : memref<64x32xbf16, #tpu.memory_space<vmem>>, vector<64x32xbf16>
    %cst = arith.constant dense<0.000000e+00> : vector<256x32xf32>
    %2 = tpu.matmul %0, %1, %cst {dimension_numbers = #tpu.dot_dimension_numbers<[1], [0], [0], [1], [0, 0, 1, 1], [], []>} : vector<256x64xbf16>, vector<64x32xbf16>, vector<256x32xf32> -> vector<256x32xf32>
    %c0_3 = arith.constant 0 : index
    %c0_4 = arith.constant 0 : index
    %3 = vector.load %arg4[%c0_3, %c0_4] : memref<1x32xf32, #tpu.memory_space<vmem>>, vector<1x32xf32>
    %4 = vector.broadcast %3 : vector<1x32xf32> to vector<256x32xf32>
    %5 = arith.addf %2, %4 : vector<256x32xf32>
    %cst_5 = arith.constant 0.000000e+00 : f32
    %6 = vector.broadcast %cst_5 : f32 to vector<256x32xf32>
    %7 = arith.maximumf %5, %6 : vector<256x32xf32>
    %8 = arith.truncf %7 : vector<256x32xf32> to vector<256x32xbf16>
    %c0_6 = arith.constant 0 : index
    %c0_7 = arith.constant 0 : index
    %9 = vector.load %arg5[%c0_6, %c0_7] : memref<32x16xbf16, #tpu.memory_space<vmem>>, vector<32x16xbf16>
    %cst_8 = arith.constant dense<0.000000e+00> : vector<256x16xf32>
    %10 = tpu.matmul %8, %9, %cst_8 {dimension_numbers = #tpu.dot_dimension_numbers<[1], [0], [0], [1], [0, 0, 1, 1], [], []>} : vector<256x32xbf16>, vector<32x16xbf16>, vector<256x16xf32> -> vector<256x16xf32>
    %c0_9 = arith.constant 0 : index
    %c0_10 = arith.constant 0 : index
    %11 = vector.load %arg6[%c0_9, %c0_10] : memref<1x16xf32, #tpu.memory_space<vmem>>, vector<1x16xf32>
    %12 = vector.broadcast %11 : vector<1x16xf32> to vector<256x16xf32>
    %13 = arith.addf %10, %12 : vector<256x16xf32>
    %cst_11 = arith.constant 0.000000e+00 : f32
    %14 = vector.broadcast %cst_11 : f32 to vector<256x16xf32>
    %15 = arith.maximumf %13, %14 : vector<256x16xf32>
    %16 = arith.truncf %15 : vector<256x16xf32> to vector<256x16xbf16>
    %c0_12 = arith.constant 0 : index
    %c0_13 = arith.constant 0 : index
    %17 = vector.load %arg2[%c0_12, %c0_13] : memref<64x256xbf16, #tpu.memory_space<vmem>>, vector<64x256xbf16>
    %cst_14 = arith.constant dense<0.000000e+00> : vector<64x16xf32>
    %18 = tpu.matmul %17, %16, %cst_14 {dimension_numbers = #tpu.dot_dimension_numbers<[1], [0], [0], [1], [0, 0, 1, 1], [], []>} : vector<64x256xbf16>, vector<256x16xbf16>, vector<64x16xf32> -> vector<64x16xf32>
    %19 = arith.truncf %18 : vector<64x16xf32> to vector<64x16xbf16>
    %c0_15 = arith.constant 0 : index
    %c0_16 = arith.constant 0 : index
    %20 = vector.load %arg7[%c0_15, %c0_16] : memref<16x20xbf16, #tpu.memory_space<vmem>>, vector<16x20xbf16>
    %cst_17 = arith.constant dense<0.000000e+00> : vector<64x20xf32>
    %21 = tpu.matmul %19, %20, %cst_17 {dimension_numbers = #tpu.dot_dimension_numbers<[1], [0], [0], [1], [0, 0, 1, 1], [], []>} : vector<64x16xbf16>, vector<16x20xbf16>, vector<64x20xf32> -> vector<64x20xf32>
    %c0_18 = arith.constant 0 : index
    %c0_19 = arith.constant 0 : index
    %22 = vector.load %arg8[%c0_18, %c0_19] : memref<1x20xf32, #tpu.memory_space<vmem>>, vector<1x20xf32>
    %23 = vector.broadcast %22 : vector<1x20xf32> to vector<64x20xf32>
    %24 = arith.addf %21, %23 : vector<64x20xf32>
    %25 = tpu.iota {dimensions = array<i32: 1>} : vector<64x20xi32>
    %c10_i32 = arith.constant 10 : i32
    %26 = vector.broadcast %c10_i32 : i32 to vector<64x20xi32>
    %27 = arith.cmpi sge, %25, %26 : vector<64x20xi32>
    %28 = math.exp %24 : vector<64x20xf32>
    %29 = arith.select %27, %28, %24 : vector<64x20xi1>, vector<64x20xf32>
    %c0_20 = arith.constant 0 : index
    %c0_21 = arith.constant 0 : index
    %30 = vector.load %arg9[%c0_20, %c0_21] : memref<64x20xf32, #tpu.memory_space<vmem>>, vector<64x20xf32>
    tpu.vector_store %arg9[%c0_20, %c0_21], %29 {strides = array<i32>} : memref<64x20xf32, #tpu.memory_space<vmem>>, vector<64x20xf32>,
    return
  }
  func.func @transform_0(%arg0: i32) -> (i32, i32) {
    %c0_i32 = arith.constant 0 : i32
    %c0_i32_0 = arith.constant 0 : i32
    return %arg0, %c0_i32 : i32, i32
  }
  func.func @transform_1(%arg0: i32) -> (i32, i32) {
    %c0_i32 = arith.constant 0 : i32
    %c0_i32_0 = arith.constant 0 : i32
    %c0_i32_1 = arith.constant 0 : i32
    return %c0_i32, %c0_i32_0 : i32, i32
  }
  func.func @transform_2(%arg0: i32) -> (i32, i32) {
    %c0_i32 = arith.constant 0 : i32
    %c0_i32_0 = arith.constant 0 : i32
    %c0_i32_1 = arith.constant 0 : i32
    return %c0_i32, %c0_i32_0 : i32, i32
  }
  func.func @transform_3(%arg0: i32) -> (i32, i32) {
    %c0_i32 = arith.constant 0 : i32
    %c0_i32_0 = arith.constant 0 : i32
    %c0_i32_1 = arith.constant 0 : i32
    return %c0_i32, %c0_i32_0 : i32, i32
  }
  func.func @transform_4(%arg0: i32) -> (i32, i32) {
    %c0_i32 = arith.constant 0 : i32
    %c0_i32_0 = arith.constant 0 : i32
    %c0_i32_1 = arith.constant 0 : i32
    return %c0_i32, %c0_i32_0 : i32, i32
  }
  func.func @transform_5(%arg0: i32) -> (i32, i32) {
    %c0_i32 = arith.constant 0 : i32
    %c0_i32_0 = arith.constant 0 : i32
    %c0_i32_1 = arith.constant 0 : i32
    return %c0_i32, %c0_i32_0 : i32, i32
  }
  func.func @transform_6(%arg0: i32) -> (i32, i32) {
    %c0_i32 = arith.constant 0 : i32
    %c0_i32_0 = arith.constant 0 : i32
    %c0_i32_1 = arith.constant 0 : i32
    return %c0_i32, %c0_i32_0 : i32, i32
  }
  func.func @transform_7(%arg0: i32) -> (i32, i32) {
    %c0_i32 = arith.constant 0 : i32
    %c0_i32_0 = arith.constant 0 : i32
    %c0_i32_1 = arith.constant 0 : i32
    return %c0_i32, %c0_i32_0 : i32, i32
  }
  func.func @transform_8(%arg0: i32) -> (i32, i32) {
    %c0_i32 = arith.constant 0 : i32
    %c0_i32_0 = arith.constant 0 : i32
    return %arg0, %c0_i32 : i32, i32
  }
}

</mosaic_0001>

<bundles_post_ra>
// kernel: tpu_custom_call.1
= control target key start
LH: loop header
LB: loop body
LE: loop exit
PB: predicated region body
PF: predicated region fallthrough
CT: control target
= control target key end

     0   :  { %vm181_vm0 = vcmask 523264   ;;  %vm462_vm1 = vcmask 261120   ;;  %vm852_vm2 = vcmask 130048   ;;  %vm957_vm4 = vcmask 162816   ;;  %s1575_s2 = inlined_call_operand.vmem [shape: bf16[64,32], index: 2, kind: input, shape index: {}]   ;;  %s1576_s0 = inlined_call_operand.vmem [shape: bf16[256,64], index: 0, kind: input, shape index: {}]   ;;  %s1577_s4 = inlined_call_operand.vmem [shape: bf16[32,16], index: 4, kind: input, shape index: {}]   ;;  %s1578_s3 = inlined_call_operand.vmem [shape: f32[1,32], index: 3, kind: input, shape index: {}]   ;;  %s1579_s1 = inlined_call_operand.vmem [shape: bf16[64,256], index: 1, kind: input, shape index: {}]   ;;  %s1580_s6 = inlined_call_operand.vmem [shape: bf16[16,20], index: 6, kind: input, shape index: {}]   ;;  %s1581_s5 = inlined_call_operand.vmem [shape: f32[1,16], index: 5, kind: input, shape index: {}]   ;;  %s1582_s7 = inlined_call_operand.vmem [shape: f32[1,20], index: 7, kind: input, shape index: {}]   ;;  %s1583_s8 = inlined_call_operand.vmem [shape: f32[64,20], index: 8, kind: output, shape index: {}]  }
   0x1   :  { %v1209_v0 = vld [vmem:[%s1575_s2] sm:$0xff]   ;;  %v1210_v1 = vld [vmem:[%s1575_s2 + $0x8] sm:$0xff]   ;;  %v1211_v2 = vld [vmem:[%s1575_s2 + $0x10] sm:$0xff]  }
   0x2   :  { %1123 = vmatprep.subr.bf16.mxu0 %v1209_v0  ;;  %v1213_v3 = vld [vmem:[%s1576_s0] sm:$0xff]   ;;  %v1212_v4 = vld [vmem:[%s1575_s2 + $0x18] sm:$0xff]   ;;  %v1214_v5 = vld [vmem:[%s1576_s0 + $0x8] sm:$0xff]  }
   0x3   :  { %1124 = vmatpush3.bf16.msra.mxu0 %v1209_v0  ;;  %1131 = vmatprep.mubr.msk.bf16.mxu0 %vm181_vm0, %v1213_v3  ;;  %v1215_v6 = vld [vmem:[%s1576_s0 + $0x10] sm:$0xff]   ;;  %v1216_v7 = vld [vmem:[%s1576_s0 + $0x18] sm:$0xff]   ;;  %v1217_v8 = vld [vmem:[%s1576_s0 + $0x20] sm:$0xff]  }
   0x4   :  { %1125 = vmatprep.subr.bf16.mxu0 %v1210_v1  ;;  %v1218_v9 = vld [vmem:[%s1576_s0 + $0x28] sm:$0xff]   ;;  %v1219_v10 = vld [vmem:[%s1576_s0 + $0x30] sm:$0xff]   ;;  %v1220_v11 = vld [vmem:[%s1576_s0 + $0x38] sm:$0xff]  }
   0x5   :  { %v1221_v12 = vld [vmem:[%s1576_s0 + $0x40] sm:$0xff]   ;;  %v1222_v13 = vld [vmem:[%s1576_s0 + $0x48] sm:$0xff]   ;;  %v1223_v14 = vld [vmem:[%s1576_s0 + $0x50] sm:$0xff]  }
   0x6   :  { %v1224_v15 = vld [vmem:[%s1576_s0 + $0x58] sm:$0xff]   ;;  %v1225_v16 = vld [vmem:[%s1576_s0 + $0x60] sm:$0xff]   ;;  %v1226_v17 = vld [vmem:[%s1576_s0 + $0x68] sm:$0xff]  }
   0x7   :  { %1126 = vmatpush3.bf16.msra.mxu0 %v1210_v1  ;;  %v1227_v18 = vld [vmem:[%s1576_s0 + $0x70] sm:$0xff]   ;;  %v1228_v19 = vld [vmem:[%s1576_s0 + $0x78] sm:$0xff]   ;;  %v1229_v20 = vld [vmem:[%s1577_s4] sm:$0xff]  }
   0x8   :  { %1127 = vmatprep.subr.bf16.mxu0 %v1211_v2  ;;  %1163 = vmatprep.subr.bf16.mxu1 %v1229_v20  ;;  %v1230_v21 = vld [vmem:[%s1577_s4 + $0x8] sm:$0xff]   ;;  %v1390_v22 = vld [vmem:[%s1578_s3] ss:$0 sm:$0xff] }
   0x9   :  { %1164 = vmatpush3.bf16.msra.mxu1 %v1229_v20 }
   0xa   :  { %1165 = vmatprep.subr.bf16.mxu1 %v1230_v21 }
   0xb   :  { %1128 = vmatpush3.bf16.msra.mxu0 %v1211_v2 }
   0xc   :  { %1129 = vmatprep.subr.bf16.mxu0 %v1212_v4 }
   0xd   :  { %1166 = vmatpush3.bf16.msra.mxu1 %v1230_v21 }
   0xf   :  { %1130 = vmatpush3.bf16.msra.mxu0 %v1212_v4 }
  0x12   :  { %1132 = vmatmul.mubr.msk.bf16.vlgmr.msra.gmra.mrb[0].mxu0 %vm181_vm0, %v1214_v5 }
  0x13   :  { %1135 = vmatprep.mubr.msk.bf16.mxu0 %vm181_vm0, %v1215_v6 }
  0x1a   :  { %1136 = vmatmul.mubr.msk.bf16.gmra.mrb[4].mxu0 %vm181_vm0, %v1216_v7 }
  0x1b   :  { %1139 = vmatprep.mubr.msk.bf16.mxu0 %vm181_vm0, %v1217_v8 }
  0x22   :  { %1140 = vmatmul.mubr.msk.bf16.gmra.mrb[8].mxu0 %vm181_vm0, %v1218_v9 }
  0x23   :  { %1143 = vmatprep.mubr.msk.bf16.mxu0 %vm181_vm0, %v1219_v10 }
  0x2a   :  { %1144 = vmatmul.mubr.msk.bf16.gmra.mrb[12].mxu0 %vm181_vm0, %v1220_v11 }
  0x2b   :  { %1147 = vmatprep.mubr.msk.bf16.mxu0 %vm181_vm0, %v1221_v12 }
  0x32   :  { %1148 = vmatmul.mubr.msk.bf16.gmra.mrb[16].mxu0 %vm181_vm0, %v1222_v13 }
  0x33   :  { %1151 = vmatprep.mubr.msk.bf16.mxu0 %vm181_vm0, %v1223_v14 }
  0x3a   :  { %1152 = vmatmul.mubr.msk.bf16.gmra.mrb[20].mxu0 %vm181_vm0, %v1224_v15 }
  0x3b   :  { %1155 = vmatprep.mubr.msk.bf16.mxu0 %vm181_vm0, %v1225_v16 }
  0x42   :  { %1156 = vmatmul.mubr.msk.bf16.gmra.mrb[24].mxu0 %vm181_vm0, %v1226_v17 }
  0x43   :  { %1159 = vmatprep.mubr.msk.bf16.mxu0 %vm181_vm0, %v1227_v18 }
  0x4a   :  { %1160 = vmatmul.mubr.msk.bf16.gmra.mrb[28].mxu0 %vm181_vm0, %v1228_v19 }
  0xe5   :  { %v1133_v23 = vpop.f32.mrb[0].mxu0 }
  0xe6   :  { %v273_v24 = vadd.f32 %v1133_v23, %v1390_v22  ;;  %v264_v25 = vpop.f32.mrb[1].mxu0 }
  0xe7   :  { %v265_v26 = vadd.f32 %v1390_v22, %v264_v25  ;;  %v1134_v27 = vpop.f32.mrb[2].mxu0 }
  0xe8   :  { %v276_v28 = vadd.f32 %v1134_v27, %v1390_v22  ;;  %v267_v29 = vpop.f32.mrb[3].mxu0  ;;  %v393_v31 = vmax.f32 %v273_v24, 0.0 }
  0xe9   :  { %v268_v30 = vadd.f32 %v1390_v22, %v267_v29  ;;  %v391_v33 = vmax.f32 %v265_v26, 0.0 }
  0xea   :  { %v394_v32 = vmax.f32 %v276_v28, 0.0 }
  0xeb   :  { %v392_v34 = vmax.f32 %v268_v30, 0.0 }
  0xec   :  { %v424_v35 = vpack.c.bf16 %v394_v32, %v393_v31 }
  0xed   :  { %v1137_v36 = vpop.f32.mrb[4].mxu0  ;;  %v423_v37 = vpack.c.bf16 %v392_v34, %v391_v33 }
  0xee   :  { %v289_v38 = vadd.f32 %v1137_v36, %v1390_v22  ;;  %v280_v39 = vpop.f32.mrb[5].mxu0 }
  0xef   :  { %v281_v40 = vadd.f32 %v1390_v22, %v280_v39  ;;  %v1138_v41 = vpop.f32.mrb[6].mxu0  ;;  %1167 = vmatprep.mubr.msk.bf16.mxu1 %vm462_vm1, %v423_v37 }
  0xf0   :  { %v292_v42 = vadd.f32 %v1138_v41, %v1390_v22  ;;  %v283_v43 = vpop.f32.mrb[7].mxu0  ;;  %1168 = vmatmul.mubr.msk.bf16.vlgmr.msra.gmra.mrb[0].mxu1 %vm462_vm1, %v424_v35  ;;  %v397_v45 = vmax.f32 %v289_v38, 0.0 }
  0xf1   :  { %v284_v44 = vadd.f32 %v1390_v22, %v283_v43  ;;  %v395_v47 = vmax.f32 %v281_v40, 0.0 }
  0xf2   :  { %v398_v46 = vmax.f32 %v292_v42, 0.0 }
  0xf3   :  { %v396_v48 = vmax.f32 %v284_v44, 0.0 }
  0xf4   :  { %v426_v49 = vpack.c.bf16 %v398_v46, %v397_v45 }
  0xf5   :  { %v425_v50 = vpack.c.bf16 %v396_v48, %v395_v47  ;;  %v1141_v51 = vpop.f32.mrb[8].mxu0 }
  0xf6   :  { %v305_v52 = vadd.f32 %v1141_v51, %v1390_v22  ;;  %v296_v53 = vpop.f32.mrb[9].mxu0 }
  0xf7   :  { %v297_v54 = vadd.f32 %v1390_v22, %v296_v53  ;;  %v1142_v55 = vpop.f32.mrb[10].mxu0  ;;  %1171 = vmatprep.mubr.msk.bf16.mxu1 %vm462_vm1, %v425_v50 }
  0xf8   :  { %v308_v56 = vadd.f32 %v1142_v55, %v1390_v22  ;;  %v299_v57 = vpop.f32.mrb[11].mxu0  ;;  %1172 = vmatmul.mubr.msk.bf16.gmra.mrb[4].mxu1 %vm462_vm1, %v426_v49  ;;  %v401_v59 = vmax.f32 %v305_v52, 0.0 }
  0xf9   :  { %v300_v58 = vadd.f32 %v1390_v22, %v299_v57  ;;  %v399_v61 = vmax.f32 %v297_v54, 0.0 }
  0xfa   :  { %v402_v60 = vmax.f32 %v308_v56, 0.0 }
  0xfb   :  { %v400_v62 = vmax.f32 %v300_v58, 0.0 }
  0xfc   :  { %v428_v63 = vpack.c.bf16 %v402_v60, %v401_v59 }
  0xfd   :  { %v427_v0 = vpack.c.bf16 %v400_v62, %v399_v61  ;;  %v1145_v1 = vpop.f32.mrb[12].mxu0 }
  0xfe   :  { %v321_v2 = vadd.f32 %v1145_v1, %v1390_v22  ;;  %v312_v3 = vpop.f32.mrb[13].mxu0 }
  0xff   :  { %v313_v4 = vadd.f32 %v1390_v22, %v312_v3  ;;  %v1146_v5 = vpop.f32.mrb[14].mxu0  ;;  %1175 = vmatprep.mubr.msk.bf16.mxu1 %vm462_vm1, %v427_v0 }
 0x100   :  { %v324_v6 = vadd.f32 %v1146_v5, %v1390_v22  ;;  %v315_v7 = vpop.f32.mrb[15].mxu0  ;;  %1176 = vmatmul.mubr.msk.bf16.gmra.mrb[8].mxu1 %vm462_vm1, %v428_v63  ;;  %v405_v9 = vmax.f32 %v321_v2, 0.0 }
 0x101   :  { %v316_v8 = vadd.f32 %v1390_v22, %v315_v7  ;;  %v403_v11 = vmax.f32 %v313_v4, 0.0 }
 0x102   :  { %v406_v10 = vmax.f32 %v324_v6, 0.0 }
 0x103   :  { %v404_v12 = vmax.f32 %v316_v8, 0.0  ;;  %v1233_v8 = vld [vmem:[%s1579_s1 + $0x4] ss:$8 sps:$4 sm:$0xff]  }
 0x104   :  { %v430_v13 = vpack.c.bf16 %v406_v10, %v405_v9  ;;  %v1243_v9 = vld [vmem:[%s1580_s6] sm:$0xff]  }
 0x105   :  { %v429_v14 = vpack.c.bf16 %v404_v12, %v403_v11  ;;  %v1149_v15 = vpop.f32.mrb[16].mxu0  ;;  %1199 = vmatprep.subr.bf16.mxu0 %v1243_v9 }
 0x106   :  { %v337_v16 = vadd.f32 %v1149_v15, %v1390_v22  ;;  %v328_v17 = vpop.f32.mrb[17].mxu0  ;;  %1200 = vmatpush3.bf16.msra.mxu0 %v1243_v9 }
 0x107   :  { %v329_v18 = vadd.f32 %v1390_v22, %v328_v17  ;;  %v1150_v19 = vpop.f32.mrb[18].mxu0  ;;  %1179 = vmatprep.mubr.msk.bf16.mxu1 %vm462_vm1, %v429_v14 }
 0x108   :  { %v340_v20 = vadd.f32 %v1150_v19, %v1390_v22  ;;  %v331_v21 = vpop.f32.mrb[19].mxu0  ;;  %1180 = vmatmul.mubr.msk.bf16.gmra.mrb[12].mxu1 %vm462_vm1, %v430_v13  ;;  %v409_v24 = vmax.f32 %v337_v16, 0.0 }
 0x109   :  { %v332_v23 = vadd.f32 %v1390_v22, %v331_v21  ;;  %v407_v26 = vmax.f32 %v329_v18, 0.0 }
 0x10a   :  { %v410_v25 = vmax.f32 %v340_v20, 0.0 }
 0x10b   :  { %v408_v27 = vmax.f32 %v332_v23, 0.0 }
 0x10c   :  { %v432_v28 = vpack.c.bf16 %v410_v25, %v409_v24 }
 0x10d   :  { %v431_v29 = vpack.c.bf16 %v408_v27, %v407_v26  ;;  %v1153_v30 = vpop.f32.mrb[20].mxu0 }
 0x10e   :  { %v353_v31 = vadd.f32 %v1153_v30, %v1390_v22  ;;  %v344_v32 = vpop.f32.mrb[21].mxu0 }
 0x10f   :  { %v345_v33 = vadd.f32 %v1390_v22, %v344_v32  ;;  %v1154_v34 = vpop.f32.mrb[22].mxu0  ;;  %1183 = vmatprep.mubr.msk.bf16.mxu1 %vm462_vm1, %v431_v29 }
 0x110   :  { %v356_v35 = vadd.f32 %v1154_v34, %v1390_v22  ;;  %v347_v36 = vpop.f32.mrb[23].mxu0  ;;  %1184 = vmatmul.mubr.msk.bf16.gmra.mrb[16].mxu1 %vm462_vm1, %v432_v28  ;;  %v413_v38 = vmax.f32 %v353_v31, 0.0 }
 0x111   :  { %v348_v37 = vadd.f32 %v1390_v22, %v347_v36  ;;  %v411_v40 = vmax.f32 %v345_v33, 0.0 }
 0x112   :  { %v414_v39 = vmax.f32 %v356_v35, 0.0 }
 0x113   :  { %v412_v41 = vmax.f32 %v348_v37, 0.0 }
 0x114   :  { %v434_v42 = vpack.c.bf16 %v414_v39, %v413_v38 }
 0x115   :  { %v433_v43 = vpack.c.bf16 %v412_v41, %v411_v40  ;;  %v1157_v44 = vpop.f32.mrb[24].mxu0 }
 0x116   :  { %v369_v45 = vadd.f32 %v1157_v44, %v1390_v22  ;;  %v360_v46 = vpop.f32.mrb[25].mxu0 }
 0x117   :  { %v361_v47 = vadd.f32 %v1390_v22, %v360_v46  ;;  %v1158_v48 = vpop.f32.mrb[26].mxu0  ;;  %1187 = vmatprep.mubr.msk.bf16.mxu1 %vm462_vm1, %v433_v43 }
 0x118   :  { %v372_v49 = vadd.f32 %v1158_v48, %v1390_v22  ;;  %v363_v50 = vpop.f32.mrb[27].mxu0  ;;  %1188 = vmatmul.mubr.msk.bf16.gmra.mrb[20].mxu1 %vm462_vm1, %v434_v42  ;;  %v417_v52 = vmax.f32 %v369_v45, 0.0 }
 0x119   :  { %v364_v51 = vadd.f32 %v1390_v22, %v363_v50  ;;  %v415_v54 = vmax.f32 %v361_v47, 0.0 }
 0x11a   :  { %v418_v53 = vmax.f32 %v372_v49, 0.0 }
 0x11b   :  { %v416_v55 = vmax.f32 %v364_v51, 0.0 }
 0x11c   :  { %v436_v56 = vpack.c.bf16 %v418_v53, %v417_v52 }
 0x11d   :  { %v435_v57 = vpack.c.bf16 %v416_v55, %v415_v54  ;;  %v1161_v58 = vpop.f32.mrb[28].mxu0 }
 0x11e   :  { %v385_v59 = vadd.f32 %v1161_v58, %v1390_v22  ;;  %v376_v60 = vpop.f32.mrb[29].mxu0 }
 0x11f   :  { %v377_v61 = vadd.f32 %v1390_v22, %v376_v60  ;;  %v1162_v62 = vpop.f32.mrb[30].mxu0  ;;  %1191 = vmatprep.mubr.msk.bf16.mxu1 %vm462_vm1, %v435_v57 }
 0x120   :  { %v388_v63 = vadd.f32 %v1162_v62, %v1390_v22  ;;  %v379_v0 = vpop.f32.mrb[31].mxu0  ;;  %1192 = vmatmul.mubr.msk.bf16.gmra.mrb[24].mxu1 %vm462_vm1, %v436_v56  ;;  %v421_v2 = vmax.f32 %v385_v59, 0.0 }
 0x121   :  { %v380_v1 = vadd.f32 %v1390_v22, %v379_v0  ;;  %v419_v4 = vmax.f32 %v377_v61, 0.0  ;;  %v1449_v22 = vld [vmem:[%s1581_s5] ss:$0 sm:$0xff] }
 0x122   :  { %v422_v3 = vmax.f32 %v388_v63, 0.0 }
 0x123   :  { %v420_v5 = vmax.f32 %v380_v1, 0.0 }
 0x124   :  { %v438_v6 = vpack.c.bf16 %v422_v3, %v421_v2 }
 0x125   :  { %v437_v7 = vpack.c.bf16 %v420_v5, %v419_v4 }
 0x127   :  { %1195 = vmatprep.mubr.msk.bf16.mxu1 %vm462_vm1, %v437_v7 }
 0x128   :  { %1196 = vmatmul.mubr.msk.bf16.gmra.mrb[28].mxu1 %vm462_vm1, %v438_v6 }
 0x129   :  { %800 = vmatprep.mubr.bf16.mxu1 %v1233_v8 }
 0x1c3   :  { %v1169_v10 = vpop.f32.mrb[0].mxu1 }
 0x1c4   :  { %v554_v11 = vadd.f32 %v1169_v10, %v1449_v22  ;;  %v545_v12 = vpop.f32.mrb[1].mxu1 }
 0x1c5   :  { %v546_v13 = vadd.f32 %v1449_v22, %v545_v12  ;;  %v1170_v14 = vpop.f32.mrb[2].mxu1 }
 0x1c6   :  { %v557_v15 = vadd.f32 %v1170_v14, %v1449_v22  ;;  %v548_v16 = vpop.f32.mrb[3].mxu1  ;;  %v674_v18 = vmax.f32 %v554_v11, 0.0 }
 0x1c7   :  { %v549_v17 = vadd.f32 %v1449_v22, %v548_v16  ;;  %v672_v20 = vmax.f32 %v546_v13, 0.0 }
 0x1c8   :  { %v675_v19 = vmax.f32 %v557_v15, 0.0 }
 0x1c9   :  { %v673_v21 = vmax.f32 %v549_v17, 0.0 }
 0x1ca   :  { %v1455_v23 = vpack.c.bf16 %v675_v19, %v674_v18 }
 0x1cb   :  { %v1457_v24 = vpack.c.bf16 %v673_v21, %v672_v20  ;;  %v1173_v25 = vpop.f32.mrb[4].mxu1 }
 0x1cc   :  { %v570_v26 = vadd.f32 %v1173_v25, %v1449_v22  ;;  %v561_v27 = vpop.f32.mrb[5].mxu1 }
 0x1cd   :  { %v562_v28 = vadd.f32 %v1449_v22, %v561_v27  ;;  %v1174_v29 = vpop.f32.mrb[6].mxu1 }
 0x1ce   :  { %v573_v30 = vadd.f32 %v1174_v29, %v1449_v22  ;;  %v564_v31 = vpop.f32.mrb[7].mxu1  ;;  %v678_v33 = vmax.f32 %v570_v26, 0.0 }
 0x1cf   :  { %v565_v32 = vadd.f32 %v1449_v22, %v564_v31  ;;  %v676_v35 = vmax.f32 %v562_v28, 0.0 }
 0x1d0   :  { %v679_v34 = vmax.f32 %v573_v30, 0.0 }
 0x1d1   :  { %v677_v36 = vmax.f32 %v565_v32, 0.0 }
 0x1d2   :  { %v1463_v37 = vpack.c.bf16 %v679_v34, %v678_v33 }
 0x1d3   :  { %v1465_v38 = vpack.c.bf16 %v677_v36, %v676_v35  ;;  %v1177_v39 = vpop.f32.mrb[8].mxu1 }
 0x1d4   :  { %v586_v40 = vadd.f32 %v1177_v39, %v1449_v22  ;;  %v577_v41 = vpop.f32.mrb[9].mxu1 }
 0x1d5   :  { %v578_v42 = vadd.f32 %v1449_v22, %v577_v41  ;;  %v1178_v43 = vpop.f32.mrb[10].mxu1 }
 0x1d6   :  { %v589_v44 = vadd.f32 %v1178_v43, %v1449_v22  ;;  %v580_v45 = vpop.f32.mrb[11].mxu1  ;;  %v682_v47 = vmax.f32 %v586_v40, 0.0 }
 0x1d7   :  { %v581_v46 = vadd.f32 %v1449_v22, %v580_v45  ;;  %v680_v49 = vmax.f32 %v578_v42, 0.0 }
 0x1d8   :  { %v683_v48 = vmax.f32 %v589_v44, 0.0 }
 0x1d9   :  { %v681_v50 = vmax.f32 %v581_v46, 0.0 }
 0x1da   :  { %v1471_v51 = vpack.c.bf16 %v683_v48, %v682_v47 }
 0x1db   :  { %v1473_v52 = vpack.c.bf16 %v681_v50, %v680_v49  ;;  %v1181_v53 = vpop.f32.mrb[12].mxu1 }
 0x1dc   :  { %v602_v54 = vadd.f32 %v1181_v53, %v1449_v22  ;;  %v593_v55 = vpop.f32.mrb[13].mxu1 }
 0x1dd   :  { %v594_v56 = vadd.f32 %v1449_v22, %v593_v55  ;;  %v1182_v57 = vpop.f32.mrb[14].mxu1 }
 0x1de   :  { %v605_v58 = vadd.f32 %v1182_v57, %v1449_v22  ;;  %v596_v59 = vpop.f32.mrb[15].mxu1  ;;  %v686_v61 = vmax.f32 %v602_v54, 0.0 }
 0x1df   :  { %v597_v60 = vadd.f32 %v1449_v22, %v596_v59  ;;  %v684_v63 = vmax.f32 %v594_v56, 0.0 }
 0x1e0   :  { %v687_v62 = vmax.f32 %v605_v58, 0.0 }
 0x1e1   :  { %v685_v0 = vmax.f32 %v597_v60, 0.0 }
 0x1e2   :  { %v1479_v1 = vpack.c.bf16 %v687_v62, %v686_v61  ;;  %v1231_v62 = vld [vmem:[%s1579_s1] ss:$8 sps:$4 sm:$0xff]  }
 0x1e3   :  { %v1481_v2 = vpack.c.bf16 %v685_v0, %v684_v63  ;;  %v1185_v3 = vpop.f32.mrb[16].mxu1  ;;  %v1239_v63 = vld [vmem:[%s1579_s1 + $0x20] ss:$8 sps:$4 sm:$0xff]   ;;  %v1240_v0 = vld [vmem:[%s1579_s1 + $0x34] ss:$8 sps:$4 sm:$0xff]  }
 0x1e4   :  { %v618_v4 = vadd.f32 %v1185_v3, %v1449_v22  ;;  %v609_v5 = vpop.f32.mrb[17].mxu1 }
 0x1e5   :  { %v610_v6 = vadd.f32 %v1449_v22, %v609_v5  ;;  %v1186_v7 = vpop.f32.mrb[18].mxu1 }
 0x1e6   :  { %v621_v8 = vadd.f32 %v1186_v7, %v1449_v22  ;;  %v612_v9 = vpop.f32.mrb[19].mxu1  ;;  %v690_v11 = vmax.f32 %v618_v4, 0.0 }
 0x1e7   :  { %v613_v10 = vadd.f32 %v1449_v22, %v612_v9  ;;  %v688_v13 = vmax.f32 %v610_v6, 0.0 }
 0x1e8   :  { %v691_v12 = vmax.f32 %v621_v8, 0.0 }
 0x1e9   :  { %v689_v14 = vmax.f32 %v613_v10, 0.0 }
 0x1ea   :  { %v713_v15 = vpack.c.bf16 %v691_v12, %v690_v11 }
 0x1eb   :  { %v712_v16 = vpack.c.bf16 %v689_v14, %v688_v13  ;;  %v1189_v17 = vpop.f32.mrb[20].mxu1 }
 0x1ec   :  { %v634_v18 = vadd.f32 %v1189_v17, %v1449_v22  ;;  %v625_v19 = vpop.f32.mrb[21].mxu1 }
 0x1ed   :  { %v626_v20 = vadd.f32 %v1449_v22, %v625_v19  ;;  %v1190_v21 = vpop.f32.mrb[22].mxu1  ;;  %1078 = vmatprep.subr.bf16.mxu1 %v712_v16 }
 0x1ee   :  { %v637_v25 = vadd.f32 %v1190_v21, %v1449_v22  ;;  %v628_v26 = vpop.f32.mrb[23].mxu1  ;;  %1079 = vmatpush3.bf16.msra.mxu1 %v1457_v24  ;;  %v694_v28 = vmax.f32 %v634_v18, 0.0 }
 0x1ef   :  { %v629_v27 = vadd.f32 %v1449_v22, %v628_v26  ;;  %1080 = vmatprep.subr.bf16.mxu1 %v713_v15  ;;  %v692_v30 = vmax.f32 %v626_v20, 0.0 }
 0x1f0   :  { %v695_v29 = vmax.f32 %v637_v25, 0.0 }
 0x1f1   :  { %v693_v31 = vmax.f32 %v629_v27, 0.0 }
 0x1f2   :  { %v715_v32 = vpack.c.bf16 %v695_v29, %v694_v28  ;;  %1081 = vmatpush3.bf16.msra.mxu1 %v1455_v23 }
 0x1f3   :  { %v714_v33 = vpack.c.bf16 %v693_v31, %v692_v30  ;;  %v1193_v34 = vpop.f32.mrb[24].mxu1 }
 0x1f4   :  { %v650_v35 = vadd.f32 %v1193_v34, %v1449_v22  ;;  %v641_v36 = vpop.f32.mrb[25].mxu1 }
 0x1f5   :  { %v642_v39 = vadd.f32 %v1449_v22, %v641_v36  ;;  %v1194_v40 = vpop.f32.mrb[26].mxu1  ;;  %1082 = vmatprep.subr.bf16.mxu1 %v714_v33  ;;  %v1034_v33 = vld [vmem:[%s1582_s7] ss:$0 sm:$0xff] }
 0x1f6   :  { %v653_v24 = vadd.f32 %v1194_v40, %v1449_v22  ;;  %v644_v41 = vpop.f32.mrb[27].mxu1  ;;  %1083 = vmatpush3.bf16.msra.mxu1 %v1465_v38  ;;  %v698_v43 = vmax.f32 %v650_v35, 0.0 }
 0x1f7   :  { %v645_v42 = vadd.f32 %v1449_v22, %v644_v41  ;;  %1084 = vmatprep.subr.bf16.mxu1 %v715_v32  ;;  %v696_v23 = vmax.f32 %v642_v39, 0.0 }
 0x1f8   :  { %v699_v44 = vmax.f32 %v653_v24, 0.0 }
 0x1f9   :  { %v697_v45 = vmax.f32 %v645_v42, 0.0 }
 0x1fa   :  { %v717_v46 = vpack.c.bf16 %v699_v44, %v698_v43  ;;  %1085 = vmatpush3.bf16.msra.mxu1 %v1463_v37 }
 0x1fb   :  { %v716_v47 = vpack.c.bf16 %v697_v45, %v696_v23  ;;  %v1197_v48 = vpop.f32.mrb[28].mxu1  ;;  %v930_v23 = vlaneseq }
 0x1fc   :  { %v666_v49 = vadd.f32 %v1197_v48, %v1449_v22  ;;  %v657_v50 = vpop.f32.mrb[29].mxu1 }
 0x1fd   :  { %v658_v53 = vadd.f32 %v1449_v22, %v657_v50  ;;  %v1198_v54 = vpop.f32.mrb[30].mxu1  ;;  %1086 = vmatprep.subr.bf16.mxu1 %v716_v47  ;;  %v931_v47 = vand.u32 127, %v930_v23 }
 0x1fe   :  { %v669_v38 = vadd.f32 %v1198_v54, %v1449_v22  ;;  %v660_v55 = vpop.f32.mrb[31].mxu1  ;;  %1087 = vmatpush3.bf16.msra.mxu1 %v1473_v52  ;;  %v702_v57 = vmax.f32 %v666_v49, 0.0  ;;  %v1237_v52 = vld [vmem:[%s1579_s1 + $0x24] ss:$8 sps:$4 sm:$0xff]  }
 0x1ff   :  { %v661_v56 = vadd.f32 %v1449_v22, %v660_v55  ;;  %1088 = vmatprep.subr.bf16.mxu1 %v717_v46  ;;  %v700_v37 = vmax.f32 %v658_v53, 0.0  ;;  %v1234_v22 = vld [vmem:[%s1579_s1 + $0x14] ss:$8 sps:$4 sm:$0xff]   ;;  %vm932_vm3 = vcmp.ge.s32.totalorder %v931_v47, 10 }
 0x200   :  { %v703_v58 = vmax.f32 %v669_v38, 0.0 }
 0x201   :  { %v701_v59 = vmax.f32 %v661_v56, 0.0 }
 0x202   :  { %v719_v60 = vpack.c.bf16 %v703_v58, %v702_v57  ;;  %1089 = vmatpush3.bf16.msra.mxu1 %v1471_v51  ;;  %v1236_v51 = vld [vmem:[%s1579_s1 + $0x10] ss:$8 sps:$4 sm:$0xff]  }
 0x203   :  { %v718_v61 = vpack.c.bf16 %v701_v59, %v700_v37 }
 0x205   :  { %1090 = vmatprep.subr.bf16.mxu1 %v718_v61 }
 0x206   :  { %1091 = vmatpush3.bf16.msra.mxu1 %v1481_v2 }
 0x207   :  { %1092 = vmatprep.subr.bf16.mxu1 %v719_v60 }
 0x20a   :  { %1093 = vmatpush3.bf16.msra.mxu1 %v1479_v1  ;;  %v1242_v1 = vld [vmem:[%s1579_s1 + $0x30] ss:$8 sps:$4 sm:$0xff]  }
 0x20d   :  { %801 = vmatmul.mubr.bf16.vlgmr.msra.gmra.mrb[32].mxu1 %v1231_v62 }
 0x20e   :  { %808 = vmatprep.mubr.bf16.mxu1 %v1234_v22 }
 0x215   :  { %809 = vmatmul.mubr.bf16.gmra.mrb[36].mxu1 %v1236_v51 }
 0x216   :  { %816 = vmatprep.mubr.bf16.mxu1 %v1237_v52 }
 0x21d   :  { %817 = vmatmul.mubr.bf16.gmra.mrb[40].mxu1 %v1239_v63 }
 0x21e   :  { %824 = vmatprep.mubr.bf16.mxu1 %v1240_v0 }
 0x225   :  { %825 = vmatmul.mubr.bf16.gmra.mrb[44].mxu1 %v1242_v1 }
 0x2e0   :  { %v1094_v2 = vpop.f32.mrb[32].mxu1 }
 0x2e1   :  { %v1095_v3 = vpop.f32.mrb[33].mxu1 }
 0x2e2   :  { %v1096_v4 = vadd.f32 %v1095_v3, %v1094_v2  ;;  %v1097_v5 = vpop.f32.mrb[34].mxu1 }
 0x2e3   :  { %v1098_v6 = vpop.f32.mrb[35].mxu1 }
 0x2e4   :  { %v1099_v7 = vadd.f32 %v1098_v6, %v1097_v5 }
 0x2e6   :  { %v833_v8 = vpack.c.bf16 %v1099_v7, %v1096_v4 }
 0x2e8   :  { %v1100_v9 = vpop.f32.mrb[36].mxu1  ;;  %1201 = vmatprep.mubr.msk.bf16.mxu0 %vm852_vm2, %v833_v8 }
 0x2e9   :  { %v1101_v10 = vpop.f32.mrb[37].mxu1 }
 0x2ea   :  { %v1102_v11 = vadd.f32 %v1101_v10, %v1100_v9  ;;  %v1103_v12 = vpop.f32.mrb[38].mxu1 }
 0x2eb   :  { %v1104_v13 = vpop.f32.mrb[39].mxu1 }
 0x2ec   :  { %v1105_v14 = vadd.f32 %v1104_v13, %v1103_v12 }
 0x2ee   :  { %v834_v15 = vpack.c.bf16 %v1105_v14, %v1102_v11 }
 0x2f0   :  { %1202 = vmatmul.mubr.msk.bf16.vlgmr.msra.gmra.mrb[32].mxu0 %vm852_vm2, %v834_v15  ;;  %v1106_v16 = vpop.f32.mrb[40].mxu1 }
 0x2f1   :  { %v1107_v17 = vpop.f32.mrb[41].mxu1 }
 0x2f2   :  { %v1108_v18 = vadd.f32 %v1107_v17, %v1106_v16  ;;  %v1109_v19 = vpop.f32.mrb[42].mxu1 }
 0x2f3   :  { %v1110_v20 = vpop.f32.mrb[43].mxu1 }
 0x2f4   :  { %v1111_v21 = vadd.f32 %v1110_v20, %v1109_v19 }
 0x2f6   :  { %v835_v25 = vpack.c.bf16 %v1111_v21, %v1108_v18 }
 0x2f8   :  { %v1112_v26 = vpop.f32.mrb[44].mxu1  ;;  %1205 = vmatprep.mubr.msk.bf16.mxu0 %vm852_vm2, %v835_v25 }
 0x2f9   :  { %v1113_v27 = vpop.f32.mrb[45].mxu1 }
 0x2fa   :  { %v1114_v28 = vadd.f32 %v1113_v27, %v1112_v26  ;;  %v1115_v29 = vpop.f32.mrb[46].mxu1 }
 0x2fb   :  { %v1116_v30 = vpop.f32.mrb[47].mxu1 }
 0x2fc   :  { %v1117_v31 = vadd.f32 %v1116_v30, %v1115_v29 }
 0x2fe   :  { %v836_v32 = vpack.c.bf16 %v1117_v31, %v1114_v28 }
 0x300   :  { %1206 = vmatmul.mubr.msk.bf16.gmra.mrb[36].mxu0 %vm852_vm2, %v836_v32 }
 0x3c3   :  { %v1203_v34 = vpop.f32.mrb[32].mxu0 }
 0x3c4   :  { %v908_v35 = vadd.f32 %v1203_v34, %v1034_v33  ;;  %v899_v36 = vpop.f32.mrb[33].mxu0 }
 0x3c5   :  { %v900_v39 = vadd.f32 %v1034_v33, %v899_v36  ;;  %v1204_v40 = vpop.f32.mrb[34].mxu0 }
 0x3c6   :  { %v937_v24 = vmul.f32 1.442695, %v908_v35  ;;  %v911_v41 = vadd.f32 %v1204_v40, %v1034_v33  ;;  %v902_v42 = vpop.f32.mrb[35].mxu0 }
 0x3c7   :  { %v933_v43 = vmul.f32 1.442695, %v900_v39  ;;  %v903_v44 = vadd.f32 %v1034_v33, %v902_v42 }
 0x3c8   :  { %1244 = vpow2.f32 %v937_v24  ;;  %v939_v45 = vmul.f32 1.442695, %v911_v41 }
 0x3c9   :  { %1246 = vpow2.f32 %v933_v43  ;;  %v935_v46 = vmul.f32 1.442695, %v903_v44 }
 0x3ca   :  { %1248 = vpow2.f32 %v939_v45 }
 0x3cb   :  { %1250 = vpow2.f32 %v935_v46 }
 0x3d2   :  { %v1245_v48 = vpop.eup %1244 }
 0x3d3   :  { %v1247_v49 = vpop.eup %1246  ;;  %v951_v50 = vsel %vm932_vm3, %v1245_v48, %v908_v35  ;;  %v1207_v53 = vpop.f32.mrb[36].mxu0 }
 0x3d4   :  { %v1249_v54 = vpop.eup %1248  ;;  %960 = vst.msk [vmem:[%s1583_s8 + $0x10] sm:$0xff] %vm957_vm4, %v951_v50  ;;  %v949_v38 = vsel %vm932_vm3, %v1247_v49, %v900_v39  ;;  %v924_v55 = vadd.f32 %v1207_v53, %v1034_v33  ;;  %v915_v56 = vpop.f32.mrb[37].mxu0 }
 0x3d5   :  { %v1251_v57 = vpop.eup %1250  ;;  %958 = vst.msk [vmem:[%s1583_s8] sm:$0xff] %vm957_vm4, %v949_v38  ;;  %v952_v58 = vsel %vm932_vm3, %v1249_v54, %v911_v41  ;;  %v916_v37 = vadd.f32 %v1034_v33, %v915_v56  ;;  %v1208_v59 = vpop.f32.mrb[38].mxu0 }
 0x3d6   :  { %961 = vst.msk [vmem:[%s1583_s8 + $0x18] sm:$0xff] %vm957_vm4, %v952_v58  ;;  %v950_v60 = vsel %vm932_vm3, %v1251_v57, %v903_v44  ;;  %v945_v61 = vmul.f32 1.442695, %v924_v55  ;;  %v927_v62 = vadd.f32 %v1208_v59, %v1034_v33  ;;  %v918_v22 = vpop.f32.mrb[39].mxu0 }
 0x3d7   :  { %959 = vst.msk [vmem:[%s1583_s8 + $0x8] sm:$0xff] %vm957_vm4, %v950_v60  ;;  %v941_v51 = vmul.f32 1.442695, %v916_v37  ;;  %v919_v52 = vadd.f32 %v1034_v33, %v918_v22 }
 0x3d8   :  { %1252 = vpow2.f32 %v945_v61  ;;  %v947_v63 = vmul.f32 1.442695, %v927_v62 }
 0x3d9   :  { %1254 = vpow2.f32 %v941_v51  ;;  %v943_v0 = vmul.f32 1.442695, %v919_v52 }
 0x3da   :  { %1256 = vpow2.f32 %v947_v63 }
 0x3db   :  { %1258 = vpow2.f32 %v943_v0 }
 0x3e2   :  { %v1253_v1 = vpop.eup %1252 }
 0x3e3   :  { %v1255_v2 = vpop.eup %1254  ;;  %v955_v3 = vsel %vm932_vm3, %v1253_v1, %v924_v55 }
 0x3e4   :  { %v1257_v4 = vpop.eup %1256  ;;  %964 = vst.msk [vmem:[%s1583_s8 + $0x30] sm:$0xff] %vm957_vm4, %v955_v3  ;;  %v953_v5 = vsel %vm932_vm3, %v1255_v2, %v916_v37 }
 0x3e5   :  { %v1259_v6 = vpop.eup %1258  ;;  %962 = vst.msk [vmem:[%s1583_s8 + $0x20] sm:$0xff] %vm957_vm4, %v953_v5  ;;  %v956_v7 = vsel %vm932_vm3, %v1257_v4, %v927_v62 }
 0x3e6   :  { %965 = vst.msk [vmem:[%s1583_s8 + $0x38] sm:$0xff] %vm957_vm4, %v956_v7  ;;  %v954_v8 = vsel %vm932_vm3, %v1259_v6, %v919_v52 }
 0x3e7   :  { %963 = vst.msk [vmem:[%s1583_s8 + $0x28] sm:$0xff] %vm957_vm4, %v954_v8 }

</bundles_post_ra>
